<compile_context>
chip_gen: v6e
topology: v6e:2x2x1
jax: 0.10.0
libtpu: 0.0.40
codegen_flags: <defaults>
</compile_context>

<pallas_src>
import jax
import jax.numpy as jnp
from jax.experimental import pallas as pl
from jax.experimental.pallas import tpu as pltpu


def _fused_mm_kernel(x1_ref, x2_ref, x3_ref, x4_ref, x5_ref, x6_ref, o_ref):
    # Three MXU contractions accumulated in f32.  HIGHEST precision = full
    # f32 matmul passes (matches torch.mm float32 semantics); with K=3 the
    # extra passes are hidden under a single MXU latency.
    hp = jax.lax.Precision.HIGHEST
    acc = jnp.dot(x1_ref[...], x6_ref[...],
                  preferred_element_type=jnp.float32, precision=hp)
    acc = acc + jnp.dot(x3_ref[...], x4_ref[...],
                        preferred_element_type=jnp.float32, precision=hp)
    acc = acc + jnp.dot(x5_ref[...], x2_ref[...],
                        preferred_element_type=jnp.float32, precision=hp)
    # NOTE: (3,3) output => masked vst.msk partial store; negligible here but
    # keep the output lane-dense (multiple of 128) if this pattern is reused
    # at larger M/N.
    o_ref[...] = acc.astype(o_ref.dtype)


def fused_mm_sum(x1, x2, x3, x4, x5, x6):
    m, k = x1.shape
    _, n = x6.shape

    # Whole-array, untiled VMEM residency: no grid, no index maps, no
    # double-buffering machinery — minimal prologue for a single invocation.
    vmem_spec = pl.BlockSpec(memory_space=pltpu.MemorySpace.VMEM)

    cost = pl.CostEstimate(
        flops=3 * 2 * m * k * n,                       # 162 FLOPs
        transcendentals=0,
        bytes_accessed=(6 * m * k + m * n) * 4,        # ~252 bytes
    )

    return pl.pallas_call(
        _fused_mm_kernel,
        out_shape=jax.ShapeDtypeStruct((m, n), jnp.float32),
        in_specs=[vmem_spec] * 6,
        out_specs=vmem_spec,
        cost_estimate=cost,
    )(x1, x2, x3, x4, x5, x6)


if __name__ == "__main__":
    key = jax.random.PRNGKey(0)
    keys = jax.random.split(key, 6)
    # Six 3x3 float32 matrices, consistent with the PyTorch module.
    x1, x2, x3, x4, x5, x6 = (
        jax.random.normal(k, (3, 3), dtype=jnp.float32) for k in keys
    )

    fused = jax.jit(fused_mm_sum)
    out = fused(x1, x2, x3, x4, x5, x6)
    out = jax.block_until_ready(out)

    # Reference computed at HIGHEST precision as well (plain `@` on TPU would
    # otherwise run bf16-pass matmuls and diverge from true f32).
    hp = jax.lax.Precision.HIGHEST
    ref = (
        jnp.dot(x1, x6, precision=hp)
        + jnp.dot(x3, x4, precision=hp)
        + jnp.dot(x5, x2, precision=hp)
    )
    assert jnp.allclose(out, ref, atol=1e-5, rtol=1e-5), (out, ref)

    print("KERNEL_OK")
</pallas_src>

<mosaic_0001>
module attributes {stable_mosaic.version = 11 : i64} {
  func.func @_fused_mm_kernel(%arg0: memref<3x3xf32, #tpu.memory_space<vmem>>, %arg1: memref<3x3xf32, #tpu.memory_space<vmem>>, %arg2: memref<3x3xf32, #tpu.memory_space<vmem>>, %arg3: memref<3x3xf32, #tpu.memory_space<vmem>>, %arg4: memref<3x3xf32, #tpu.memory_space<vmem>>, %arg5: memref<3x3xf32, #tpu.memory_space<vmem>>, %arg6: memref<3x3xf32, #tpu.memory_space<vmem>>) attributes {dimension_semantics = [], scalar_prefetch = 0 : i64, scratch_operands = 0 : i64, tpu.core_type = #tpu.core_type<tc>} {
    %c0 = arith.constant 0 : index
    %c0_0 = arith.constant 0 : index
    %0 = vector.load %arg0[%c0, %c0_0] : memref<3x3xf32, #tpu.memory_space<vmem>>, vector<3x3xf32>
    %c0_1 = arith.constant 0 : index
    %c0_2 = arith.constant 0 : index
    %1 = vector.load %arg5[%c0_1, %c0_2] : memref<3x3xf32, #tpu.memory_space<vmem>>, vector<3x3xf32>
    %cst = arith.constant dense<0.000000e+00> : vector<3x3xf32>
    %2 = tpu.matmul %0, %1, %cst {dimension_numbers = #tpu.dot_dimension_numbers<[1], [0], [0], [1], [0, 0, 1, 1], [], []>, precision = #tpu.contract_precision<fp32>} : vector<3x3xf32>, vector<3x3xf32>, vector<3x3xf32> -> vector<3x3xf32>
    %c0_3 = arith.constant 0 : index
    %c0_4 = arith.constant 0 : index
    %3 = vector.load %arg2[%c0_3, %c0_4] : memref<3x3xf32, #tpu.memory_space<vmem>>, vector<3x3xf32>
    %c0_5 = arith.constant 0 : index
    %c0_6 = arith.constant 0 : index
    %4 = vector.load %arg3[%c0_5, %c0_6] : memref<3x3xf32, #tpu.memory_space<vmem>>, vector<3x3xf32>
    %cst_7 = arith.constant dense<0.000000e+00> : vector<3x3xf32>
    %5 = tpu.matmul %3, %4, %cst_7 {dimension_numbers = #tpu.dot_dimension_numbers<[1], [0], [0], [1], [0, 0, 1, 1], [], []>, precision = #tpu.contract_precision<fp32>} : vector<3x3xf32>, vector<3x3xf32>, vector<3x3xf32> -> vector<3x3xf32>
    %6 = arith.addf %2, %5 : vector<3x3xf32>
    %c0_8 = arith.constant 0 : index
    %c0_9 = arith.constant 0 : index
    %7 = vector.load %arg4[%c0_8, %c0_9] : memref<3x3xf32, #tpu.memory_space<vmem>>, vector<3x3xf32>
    %c0_10 = arith.constant 0 : index
    %c0_11 = arith.constant 0 : index
    %8 = vector.load %arg1[%c0_10, %c0_11] : memref<3x3xf32, #tpu.memory_space<vmem>>, vector<3x3xf32>
    %cst_12 = arith.constant dense<0.000000e+00> : vector<3x3xf32>
    %9 = tpu.matmul %7, %8, %cst_12 {dimension_numbers = #tpu.dot_dimension_numbers<[1], [0], [0], [1], [0, 0, 1, 1], [], []>, precision = #tpu.contract_precision<fp32>} : vector<3x3xf32>, vector<3x3xf32>, vector<3x3xf32> -> vector<3x3xf32>
    %10 = arith.addf %6, %9 : vector<3x3xf32>
    %c0_13 = arith.constant 0 : index
    %c0_14 = arith.constant 0 : index
    %11 = vector.load %arg6[%c0_13, %c0_14] : memref<3x3xf32, #tpu.memory_space<vmem>>, vector<3x3xf32>
    tpu.vector_store %arg6[%c0_13, %c0_14], %10 {strides = array<i32>} : memref<3x3xf32, #tpu.memory_space<vmem>>, vector<3x3xf32>,
    return
  }
}

</mosaic_0001>

<bundles_post_ra>
// kernel: fused_mm_sum.1
= control target key start
LH: loop header
LB: loop body
LE: loop exit
PB: predicated region body
PF: predicated region fallthrough
CT: control target
= control target key end

     0   :  { %11 = vsyncpa [#allocation3], 0  ;;  %s1843_s0 = inlined_call_operand.hbm [shape: f32[3,3], index: 0, kind: input, shape index: {}]   ;;  %s1844_s1 = inlined_call_operand.hbm [shape: f32[3,3], index: 1, kind: input, shape index: {}]   ;;  %s1845_s2 = inlined_call_operand.hbm [shape: f32[3,3], index: 2, kind: input, shape index: {}]   ;;  %s1846_s3 = inlined_call_operand.vmem [shape: f32[3,3], index: 3, kind: input, shape index: {}]   ;;  %s1847_s4 = inlined_call_operand.hbm [shape: f32[3,3], index: 4, kind: input, shape index: {}]   ;;  %s1848_s5 = inlined_call_operand.vmem [shape: f32[3,3], index: 5, kind: input, shape index: {}]   ;;  %s1849_s6 = inlined_call_operand.hbm [shape: f32[3,3], index: 6, kind: output, shape index: {}]  }
   0x1   :  { %12 = vsyncpa [#allocation6], 0 }
   0x2   :  { %13 = vsyncpa [#allocation9], 0 }
   0x3   :  { %14 = vsyncpa [#allocation4], 0  ;;  %s1696_s21 = smov [#allocation5]   ;;  %s1697_s23 = smov [#allocation2]  }
   0x4   :  { %s31_s22 = sshll.u32 %s1696_s21, 4  ;;  %s21_s24 = sshll.u32 %s1697_s23, 4  ;;  %s32_s22 = int_to_ptr.vmem [resolvable:$true] %s31_s22  ;;  %s22_s24 = int_to_ptr.vmem [resolvable:$true] %s21_s24 }
   0x5   :  { %s1596_s25 = scalar_lea.vmem %s32_s22, 64  ;;  %p1601_p1 = scmp.lt.s32.totalorder %s32_s22, %s32_s22 }
   0x6   :  { %p1597_p0 = scmp.ne.s32.totalorder %s32_s22, %s1596_s25  ;;  %p1602_p2 = scmp.lt.s32.totalorder %s1596_s25, %s1596_s25 }
   0x8   :  { %p1603_p3 = por %p1602_p2, %p1601_p1 }
   0xa   :  { %p1604_p4 = pnand %p1603_p3, %p1597_p0 }
   0xc   :  { %1607 = shalt.err (!%p1604_p4)
}
   0xd   :  { %34 = dma.hbm_to_vmem [thread:$0]  %s1844_s1, 64, %s32_s22, [#allocation6]  }
   0xe   :  { %s1616_s28 = scalar_lea.vmem %s22_s24, 64  ;;  %p1621_p6 = scmp.lt.s32.totalorder %s22_s24, %s22_s24 }
   0xf   :  { %p1617_p5 = scmp.ne.s32.totalorder %s22_s24, %s1616_s28  ;;  %p1622_p7 = scmp.lt.s32.totalorder %s1616_s28, %s1616_s28 }
  0x11   :  { %p1623_p8 = por %p1622_p7, %p1621_p6 }
  0x13   :  { %p1624_p9 = pnand %p1623_p8, %p1617_p5 }
  0x15   :  { %1627 = shalt.err (!%p1624_p9)
}
  0x16   :  { %24 = dma.hbm_to_vmem [thread:$0]  %s1843_s0, 64, %s22_s24, [#allocation3]  }
  0x17   :  { %s1698_s7 = smov [#allocation7]   ;;  %s1699_s9 = smov [#allocation8]  }
  0x18   :  { %s41_s8 = sshll.u32 %s1698_s7, 4  ;;  %s53_s10 = sshll.u32 %s1699_s9, 4  ;;  %s42_s8 = int_to_ptr.vmem [resolvable:$true] %s41_s8  ;;  %s54_s10 = int_to_ptr.vmem [resolvable:$true] %s53_s10 }
  0x19   :  { %s1636_s11 = scalar_lea.vmem %s42_s8, 64  ;;  %p1641_p11 = scmp.lt.s32.totalorder %s42_s8, %s42_s8 }
  0x1a   :  { %p1637_p10 = scmp.ne.s32.totalorder %s42_s8, %s1636_s11  ;;  %p1642_p12 = scmp.lt.s32.totalorder %s1636_s11, %s1636_s11 }
  0x1c   :  { %p1643_p13 = por %p1642_p12, %p1641_p11 }
  0x1e   :  { %p1644_p0 = pnand %p1643_p13, %p1637_p10 }
  0x20   :  { %1647 = shalt.err (!%p1644_p0)
}
  0x21   :  { %44 = dma.hbm_to_vmem [thread:$0]  %s1845_s2, 64, %s42_s8, [#allocation6]  }
  0x22   :  { %s1656_s13 = scalar_lea.vmem %s54_s10, 64  ;;  %p1661_p2 = scmp.lt.s32.totalorder %s54_s10, %s54_s10 }
  0x23   :  { %p1657_p1 = scmp.ne.s32.totalorder %s54_s10, %s1656_s13  ;;  %p1662_p3 = scmp.lt.s32.totalorder %s1656_s13, %s1656_s13 }
  0x25   :  { %p1663_p4 = por %p1662_p3, %p1661_p2 }
  0x27   :  { %p1664_p5 = pnand %p1663_p4, %p1657_p1 }
  0x29   :  { %1667 = shalt.err (!%p1664_p5)
}
  0x2a   :  { %56 = dma.hbm_to_vmem [thread:$0]  %s1847_s4, 64, %s54_s10, [#allocation9]  }
  0x2b   :  { %1688 = dma.done.wait [#allocation3], 64  }
  0x2c   :  { %1689 = vsyncadd [#allocation3], 4294967232 }
  0x2d   :  { %1690 = dma.done.wait [#allocation6], 128  }
  0x2e   :  { %1691 = vsyncadd [#allocation6], 4294967168 }
  0x2f   :  { %1692 = dma.done.wait [#allocation9], 64  }
  0x30   :  { %1693 = vsyncadd [#allocation9], 4294967232  ;;  %v1700_v0 = vmov 0.0   ;;  %vm1701_vm0 = vmmov 0   ;;  %vm79_vm1 = vcmask 1042432   ;;  %vm75_vm2 = vcmask 23552  }
  0x31   :  { %1491 = vmatprep.subr.mxu0 %v1700_v0  ;;  %1493 = vmatprep.mubr.msk.f32.mxu0 %vm1701_vm0, %v1700_v0  ;;  %v74_v1 = vld [vmem:[%s1846_s3] sm:$0x7]  ;;  %v73_v2 = vld [vmem:[#allocation7] sm:$0x7]  ;;  %v982_v21 = vld [vmem:[#allocation5] sm:$0x7] }
  0x32   :  { %1496 = vmatprep.subr.mxu1 %v1700_v0  ;;  %1498 = vmatprep.mubr.msk.f32.mxu1 %vm1701_vm0, %v1700_v0  ;;  %v72_v3 = vld [vmem:[%s1848_s5] sm:$0x7]  ;;  %v81_v4 = vsel %vm79_vm1, %v74_v1, 0  ;;  %v77_v5 = vsel %vm75_vm2, %v73_v2, 0  ;;  %v981_v24 = vld [vmem:[#allocation8] sm:$0x7] }
  0x33   :  { %v533_v6 = vsel %vm79_vm1, %v72_v3, 0  ;;  %v71_v7 = vld [vmem:[#allocation2] sm:$0x7]  ;;  %v114_v8 = vand.u32 4294901760, %v81_v4  ;;  %v149_v9 = vand.u32 4294901760, %v77_v5  ;;  %v987_v27 = vsel %vm79_vm1, %v982_v21, 0 }
  0x34   :  { %v530_v10 = vsel %vm75_vm2, %v71_v7, 0  ;;  %v1766_v11 = vand.u32 4294901760, %v533_v6  ;;  %v984_v28 = vsel %vm75_vm2, %v981_v24, 0  ;;  %v1779_v30 = vand.u32 4294901760, %v987_v27  ;;  %s1702_s3 = smov [#allocation10]  }
  0x35   :  { %1492 = vmatpush3.msra.mxu0 %v114_v8  ;;  %v150_v12 = vsub.f32 %v77_v5, %v149_v9  ;;  %v191_v13 = vsub.f32 %v81_v4, %v114_v8  ;;  %v1768_v14 = vand.u32 4294901760, %v530_v10  ;;  %v1783_v32 = vand.u32 4294901760, %v984_v28  ;;  %s1444_s5 = sshll.u32 %s1702_s3, 4  ;;  %s1445_s5 = int_to_ptr.vmem [resolvable:$true] %s1444_s5 }
  0x36   :  { %1501 = vmatprep.subr.mxu0 %v1700_v0  ;;  %v643_v17 = vsub.f32 %v533_v6, %v1766_v11  ;;  %v1097_v34 = vsub.f32 %v987_v27, %v1779_v30  ;;  %vm1436_vm3 = vcmask 18432   ;;  %s1668_s17 = scalar_lea.vmem %s1445_s5, 64  ;;  %p1673_p7 = scmp.lt.s32.totalorder %s1445_s5, %s1445_s5 }
  0x37   :  { %v151_v15 = vand.u32 4294901760, %v150_v12  ;;  %v192_v16 = vand.u32 4294901760, %v191_v13  ;;  %v602_v20 = vsub.f32 %v530_v10, %v1768_v14  ;;  %v1056_v36 = vsub.f32 %v984_v28, %v1783_v32  ;;  %p1669_p6 = scmp.ne.s32.totalorder %s1445_s5, %s1668_s17  ;;  %p1674_p8 = scmp.lt.s32.totalorder %s1668_s17, %s1668_s17 }
  0x38   :  { %v644_v25 = vand.u32 4294901760, %v643_v17  ;;  %v1098_v37 = vand.u32 4294901760, %v1097_v34 }
  0x39   :  { %v152_v18 = vsub.f32 %v150_v12, %v151_v15  ;;  %v193_v19 = vsub.f32 %v191_v13, %v192_v16  ;;  %v603_v26 = vand.u32 4294901760, %v602_v20  ;;  %v1057_v38 = vand.u32 4294901760, %v1056_v36  ;;  %p1675_p9 = por %p1674_p8, %p1673_p7 }
  0x3a   :  { %v645_v29 = vsub.f32 %v643_v17, %v644_v25  ;;  %v1099_v39 = vsub.f32 %v1097_v34, %v1098_v37 }
  0x3b   :  { %v153_v22 = vand.u32 4294901760, %v152_v18  ;;  %v194_v23 = vand.u32 4294901760, %v193_v19  ;;  %v604_v31 = vsub.f32 %v602_v20, %v603_v26  ;;  %v1058_v40 = vsub.f32 %v1056_v36, %v1057_v38  ;;  %p1676_p10 = pnand %p1675_p9, %p1669_p6 }
  0x3c   :  { %v646_v33 = vand.u32 4294901760, %v645_v29  ;;  %v1100_v41 = vand.u32 4294901760, %v1099_v39 }
  0x3d   :  { %1494 = vmatmul.mubr.f32.vlgmr.msra.gmra.mxu0 %v153_v22  ;;  %1497 = vmatpush3.msra.mxu1 %v194_v23  ;;  %v605_v35 = vand.u32 4294901760, %v604_v31  ;;  %v1059_v42 = vand.u32 4294901760, %v1058_v40 }
  0x3e   :  { %1502 = vmatpush3.msra.mxu0 %v191_v13  ;;  %1499 = vmatmul.mubr.f32.vlgmr.msra.gmra.mxu1 %v149_v9 }
  0x3f   :  { %1506 = vmatprep.subr.mxu1 %v1700_v0  ;;  %1503 = vmatprep.mubr.msk.f32.mxu0 %vm1701_vm0, %v1700_v0 }
  0x40   :  { %1507 = vmatpush3.msra.mxu1 %v114_v8  ;;  %1511 = vmatprep.subr.mxu0 %v1700_v0 }
  0x41   :  { %1504 = vmatmul.mubr.f32.vlgmr.msra.gmra.mxu0 %v150_v12  ;;  %1508 = vmatprep.mubr.msk.f32.mxu1 %vm1701_vm0, %v1700_v0 }
  0x42   :  { %1512 = vmatpush3.msra.mxu0 %v192_v16  ;;  %1509 = vmatmul.mubr.f32.vlgmr.msra.gmra.mxu1 %v151_v15 }
  0x43   :  { %1516 = vmatprep.subr.mxu1 %v1700_v0  ;;  %1513 = vmatprep.mubr.msk.f32.mxu0 %vm1701_vm0, %v1700_v0 }
  0x44   :  { %1517 = vmatpush3.msra.mxu1 %v114_v8  ;;  %1521 = vmatprep.subr.mxu0 %v1700_v0 }
  0x45   :  { %1514 = vmatmul.mubr.f32.vlgmr.msra.gmra.mxu0 %v149_v9  ;;  %1518 = vmatprep.mubr.msk.f32.mxu1 %vm1701_vm0, %v1700_v0 }
  0x46   :  { %1522 = vmatpush3.msra.mxu0 %v1766_v11  ;;  %1519 = vmatmul.mubr.f32.vlgmr.msra.gmra.mxu1 %v149_v9 }
  0x47   :  { %1526 = vmatprep.subr.mxu1 %v1700_v0  ;;  %1523 = vmatprep.mubr.msk.f32.mxu0 %vm1701_vm0, %v1700_v0 }
  0x48   :  { %1527 = vmatpush3.msra.mxu1 %v646_v33  ;;  %1531 = vmatprep.subr.mxu0 %v1700_v0 }
  0x49   :  { %1524 = vmatmul.mubr.f32.vlgmr.msra.gmra.mxu0 %v605_v35  ;;  %1528 = vmatprep.mubr.msk.f32.mxu1 %vm1701_vm0, %v1700_v0 }
  0x4a   :  { %1532 = vmatpush3.msra.mxu0 %v643_v17  ;;  %1529 = vmatmul.mubr.f32.vlgmr.msra.gmra.mxu1 %v1768_v14 }
  0x4b   :  { %1536 = vmatprep.subr.mxu1 %v1700_v0  ;;  %1533 = vmatprep.mubr.msk.f32.mxu0 %vm1701_vm0, %v1700_v0 }
  0x4c   :  { %1537 = vmatpush3.msra.mxu1 %v1766_v11  ;;  %1541 = vmatprep.subr.mxu0 %v1700_v0 }
  0x4d   :  { %1534 = vmatmul.mubr.f32.vlgmr.msra.gmra.mxu0 %v602_v20  ;;  %1538 = vmatprep.mubr.msk.f32.mxu1 %vm1701_vm0, %v1700_v0 }
  0x4e   :  { %1542 = vmatpush3.msra.mxu0 %v644_v25  ;;  %1539 = vmatmul.mubr.f32.vlgmr.msra.gmra.mxu1 %v603_v26 }
  0x4f   :  { %1546 = vmatprep.subr.mxu1 %v1700_v0  ;;  %1543 = vmatprep.mubr.msk.f32.mxu0 %vm1701_vm0, %v1700_v0 }
  0x50   :  { %1547 = vmatpush3.msra.mxu1 %v1766_v11  ;;  %1551 = vmatprep.subr.mxu0 %v1700_v0 }
  0x51   :  { %1544 = vmatmul.mubr.f32.vlgmr.msra.gmra.mxu0 %v1768_v14  ;;  %1548 = vmatprep.mubr.msk.f32.mxu1 %vm1701_vm0, %v1700_v0 }
  0x52   :  { %1552 = vmatpush3.msra.mxu0 %v1779_v30  ;;  %1549 = vmatmul.mubr.f32.vlgmr.msra.gmra.mxu1 %v1768_v14 }
  0x53   :  { %1556 = vmatprep.subr.mxu1 %v1700_v0  ;;  %1553 = vmatprep.mubr.msk.f32.mxu0 %vm1701_vm0, %v1700_v0 }
  0x54   :  { %1557 = vmatpush3.msra.mxu1 %v1100_v41  ;;  %1561 = vmatprep.subr.mxu0 %v1700_v0 }
  0x55   :  { %1554 = vmatmul.mubr.f32.vlgmr.msra.gmra.mxu0 %v1059_v42  ;;  %1558 = vmatprep.mubr.msk.f32.mxu1 %vm1701_vm0, %v1700_v0 }
  0x56   :  { %1562 = vmatpush3.msra.mxu0 %v1097_v34  ;;  %1559 = vmatmul.mubr.f32.vlgmr.msra.gmra.mxu1 %v1783_v32 }
  0x57   :  { %1566 = vmatprep.subr.mxu1 %v1700_v0  ;;  %1563 = vmatprep.mubr.msk.f32.mxu0 %vm1701_vm0, %v1700_v0 }
  0x58   :  { %1567 = vmatpush3.msra.mxu1 %v1779_v30  ;;  %1571 = vmatprep.subr.mxu0 %v1700_v0 }
  0x59   :  { %1564 = vmatmul.mubr.f32.vlgmr.msra.gmra.mxu0 %v1056_v36  ;;  %1568 = vmatprep.mubr.msk.f32.mxu1 %vm1701_vm0, %v1700_v0 }
  0x5a   :  { %1572 = vmatpush3.msra.mxu0 %v1098_v37  ;;  %1569 = vmatmul.mubr.f32.vlgmr.msra.gmra.mxu1 %v1057_v38 }
  0x5b   :  { %1576 = vmatprep.subr.mxu1 %v1700_v0  ;;  %1573 = vmatprep.mubr.msk.f32.mxu0 %vm1701_vm0, %v1700_v0 }
  0x5c   :  { %1577 = vmatpush3.msra.mxu1 %v1779_v30  ;;  %1578 = vmatprep.mubr.msk.f32.mxu1 %vm1701_vm0, %v1700_v0 }
  0x5d   :  { %1574 = vmatmul.mubr.f32.vlgmr.msra.gmra.mxu0 %v1783_v32 }
  0x5e   :  { %1579 = vmatmul.mubr.f32.vlgmr.msra.gmra.mxu1 %v1783_v32 }
  0xfd   :  { %v155_v43 = vpop.f32.mrf.mxu0 }
  0xfe   :  { %v231_v44 = vpop.f32.mrf.mxu1 }
  0xff   :  { %v232_v45 = vadd.f32 %v231_v44, %v155_v43  ;;  %v1495_v46 = vpop.f32.mrf.mxu0 }
 0x100   :  { %v1500_v47 = vpop.f32.mrf.mxu1 }
 0x101   :  { %v305_v48 = vpop.f32.mrf.mxu0 }
 0x102   :  { %v306_v49 = vadd.f32 %v305_v48, %v232_v45  ;;  %v379_v50 = vpop.f32.mrf.mxu1 }
 0x103   :  { %v1505_v51 = vpop.f32.mrf.mxu0 }
 0x104   :  { %v380_v52 = vadd.f32 %v379_v50, %v306_v49  ;;  %v1510_v53 = vpop.f32.mrf.mxu1 }
 0x105   :  { %v453_v54 = vpop.f32.mrf.mxu0 }
 0x106   :  { %v454_v55 = vadd.f32 %v453_v54, %v380_v52  ;;  %v525_v56 = vpop.f32.mrf.mxu1 }
 0x107   :  { %v1515_v57 = vpop.f32.mrf.mxu0 }
 0x108   :  { %v526_v58 = vadd.f32 %v525_v56, %v454_v55  ;;  %v1520_v59 = vpop.f32.mrf.mxu1 }
 0x109   :  { %v607_v60 = vpop.f32.mrf.mxu0 }
 0x10a   :  { %v683_v61 = vpop.f32.mrf.mxu1  ;;  %v608_v63 = vadd.f32 %v607_v60, %v526_v58 }
 0x10b   :  { %v1525_v62 = vpop.f32.mrf.mxu0 }
 0x10c   :  { %v1530_v0 = vpop.f32.mrf.mxu1  ;;  %v684_v4 = vadd.f32 %v683_v61, %v608_v63 }
 0x10d   :  { %v757_v1 = vpop.f32.mrf.mxu0 }
 0x10e   :  { %v831_v2 = vpop.f32.mrf.mxu1  ;;  %v758_v9 = vadd.f32 %v757_v1, %v684_v4 }
 0x10f   :  { %v1535_v3 = vpop.f32.mrf.mxu0 }
 0x110   :  { %v1540_v5 = vpop.f32.mrf.mxu1  ;;  %v832_v15 = vadd.f32 %v831_v2, %v758_v9 }
 0x111   :  { %v905_v6 = vpop.f32.mrf.mxu0 }
 0x112   :  { %v977_v7 = vpop.f32.mrf.mxu1  ;;  %v906_v21 = vadd.f32 %v905_v6, %v832_v15 }
 0x113   :  { %v1545_v8 = vpop.f32.mrf.mxu0 }
 0x114   :  { %v1550_v10 = vpop.f32.mrf.mxu1  ;;  %v978_v28 = vadd.f32 %v977_v7, %v906_v21 }
 0x115   :  { %v1061_v11 = vpop.f32.mrf.mxu0 }
 0x116   :  { %v1137_v12 = vpop.f32.mrf.mxu1 }
 0x117   :  { %v1138_v13 = vadd.f32 %v1137_v12, %v1061_v11  ;;  %v1555_v14 = vpop.f32.mrf.mxu0 }
 0x118   :  { %v1560_v16 = vpop.f32.mrf.mxu1 }
 0x119   :  { %v1211_v17 = vpop.f32.mrf.mxu0 }
 0x11a   :  { %v1212_v18 = vadd.f32 %v1211_v17, %v1138_v13  ;;  %v1285_v19 = vpop.f32.mrf.mxu1 }
 0x11b   :  { %v1565_v20 = vpop.f32.mrf.mxu0 }
 0x11c   :  { %v1286_v22 = vadd.f32 %v1285_v19, %v1212_v18  ;;  %v1570_v23 = vpop.f32.mrf.mxu1 }
 0x11d   :  { %v1359_v24 = vpop.f32.mrf.mxu0 }
 0x11e   :  { %v1360_v25 = vadd.f32 %v1359_v24, %v1286_v22  ;;  %v1431_v26 = vpop.f32.mrf.mxu1 }
 0x11f   :  { %v1575_v27 = vpop.f32.mrf.mxu0 }
 0x120   :  { %v1432_v29 = vadd.f32 %v1431_v26, %v1360_v25  ;;  %v1580_v30 = vpop.f32.mrf.mxu1 }
 0x122   :  { %v1435_v31 = vadd.f32 %v1432_v29, %v978_v28 }
 0x124   :  { %1437 = vst.msk [vmem:[#allocation10] sm:$0x7] %vm1436_vm3, %v1435_v31 }
 0x125   :  { %1679 = shalt.err (!%p1676_p10)
}
 0x126   :  { %1447 = dma.vmem_to_hbm [thread:$0]  %s1445_s5, 64, %s1849_s6, [#allocation4]  }
 0x127   :  { %1694 = dma.done.wait [#allocation4], 64  }
 0x128   :  { %1695 = vsyncadd [#allocation4], 4294967232 }
 0x129   :  { %1451 = vsyncpa [#allocation3], 1 }
 0x12a   :  { %1452 = vsyncpa [#allocation6], 1 }
 0x12b   :  { %1453 = vsyncpa [#allocation9], 1 }
 0x12c   :  { %1454 = vsyncpa [#allocation4], 1 }

</bundles_post_ra>
